<compile_context>
chip_gen: v5e
topology: v5e:2x2
jax: 0.10.0
libtpu: 0.0.40
codegen_flags: <defaults>
</compile_context>

<pallas_src>
import math
import functools

import jax
import jax.numpy as jnp
from jax.experimental import pallas as pl
from jax.experimental.pallas import tpu as pltpu


LN_EPS = 1e-5


def _layernorm(v, w, b):
    mu = jnp.mean(v, axis=-1, keepdims=True)
    var = jnp.mean((v - mu) ** 2, axis=-1, keepdims=True)
    return (v - mu) * jax.lax.rsqrt(var + LN_EPS) * w + b


def _gelu_tanh(u):
    # PyTorch nn.GELU(approximate='tanh')
    return 0.5 * u * (1.0 + jnp.tanh(0.7978845608028654 * (u + 0.044715 * u * u * u)))


# ----------------------------------------------------------------------------
# Fused transformer Block kernel: one program per sequence (grid=(B,))
# ----------------------------------------------------------------------------
def block_kernel(x_ref, ln1w_ref, ln1b_ref,
                 wqkv_ref, bqkv_ref, wo_ref, bo_ref,
                 ln2w_ref, ln2b_ref,
                 wfc_ref, bfc_ref, wp_ref, bp_ref,
                 o_ref, y_scr, *, seq, n_head, head_dim, n_embd):
    x = x_ref[...]                                        # (T, C)
    C = n_embd

    # ---- attention branch ----
    h = _layernorm(x, ln1w_ref[0], ln1b_ref[0])           # (T, C)

    # fused QKV projection: lane-dense N = 3C, single bias add.
    # (Q slice of weight/bias is pre-scaled by 1/sqrt(head_dim) on the host.)
    qkv = jnp.dot(h, wqkv_ref[...],
                  preferred_element_type=jnp.float32) + bqkv_ref[0]   # (T, 3C)

    # plain causal mask for one sequence: no div/mod on the flattened batch
    row = jax.lax.broadcasted_iota(jnp.int32, (seq, seq), 0)
    col = jax.lax.broadcasted_iota(jnp.int32, (seq, seq), 1)
    causal = col <= row

    # per-head score / softmax / P@V; heads split only here (static slices),
    # outputs written back into one lane-dense (T, C) slab for the projection.
    # TODO(synk): for large T switch this to a KV-block streamed online-softmax
    # loop so the (T, T) score tile never exceeds VMEM.
    for hh in range(n_head):                              # static, small loop
        lo = hh * head_dim
        q = qkv[:, lo:lo + head_dim]                      # (T, hd), pre-scaled
        k = qkv[:, C + lo:C + lo + head_dim]
        v = qkv[:, 2 * C + lo:2 * C + lo + head_dim]

        # contract head dims directly (no explicit k.T)
        s = jax.lax.dot_general(q, k, (((1,), (1,)), ((), ())),
                                preferred_element_type=jnp.float32)   # (T, T)
        s = jnp.where(causal, s, -1e30)
        s = s - jnp.max(s, axis=-1, keepdims=True)
        p = jnp.exp(s)
        denom = jnp.sum(p, axis=-1, keepdims=True)        # (T, 1)

        ho = jnp.dot(p, v, preferred_element_type=jnp.float32)        # (T, hd)
        # normalize AFTER P@V on the (T, hd) output with an EUP reciprocal
        y_scr[:, lo:lo + head_dim] = ho * pl.reciprocal(denom, approx=True)

    # single fused output projection over all heads (lane-dense K = C)
    x = x + jnp.dot(y_scr[...], wo_ref[...],
                    preferred_element_type=jnp.float32) + bo_ref[0]

    # ---- MLP branch ----
    # TODO(synk): for real C (>=1024) tile the 4C hidden dim over a grid axis
    # with a VMEM accumulator so wfc/wp and the (T,4C) intermediate are never
    # fully resident (v7x has only 64 MiB VMEM).
    h2 = _layernorm(x, ln2w_ref[0], ln2b_ref[0])
    u = jnp.dot(h2, wfc_ref[...], preferred_element_type=jnp.float32) + bfc_ref[0]
    u = _gelu_tanh(u)
    m = jnp.dot(u, wp_ref[...], preferred_element_type=jnp.float32) + bp_ref[0]

    o_ref[...] = x + m                                    # single slab write


# ----------------------------------------------------------------------------
# One-time parameter prep (hoisted out of the forward): fold the attention
# scale 1/sqrt(head_dim) into the Q slice of the fused QKV weight and bias.
# ----------------------------------------------------------------------------
def prepare_block_params(params, n_head):
    (ln1w, ln1b, wqkv, bqkv, wo, bo, ln2w, ln2b, wfc, bfc, wp, bp) = params
    C = wqkv.shape[0]
    hd = C // n_head
    scale = 1.0 / math.sqrt(hd)
    col_scale = jnp.concatenate(
        [jnp.full((1, C), scale, jnp.float32), jnp.ones((1, 2 * C), jnp.float32)],
        axis=1)
    return (ln1w, ln1b, wqkv * col_scale, bqkv * col_scale, wo, bo,
            ln2w, ln2b, wfc, bfc, wp, bp)


def run_block(x, prepped, n_head):
    B, T, C = x.shape
    hd = C // n_head
    (ln1w, ln1b, wqkv, bqkv, wo, bo, ln2w, ln2b, wfc, bfc, wp, bp) = prepped

    kernel = functools.partial(block_kernel, seq=T, n_head=n_head,
                               head_dim=hd, n_embd=C)

    # weights: constant index_map across the batch grid -> fetched once
    def const(shape):
        return pl.BlockSpec(shape, lambda b: (0,) * len(shape))

    out = pl.pallas_call(
        kernel,
        out_shape=jax.ShapeDtypeStruct((B, T, C), jnp.float32),
        grid=(B,),
        in_specs=[
            pl.BlockSpec((None, T, C), lambda b: (b, 0, 0)),   # x: one sequence
            const((1, C)), const((1, C)),                      # ln1 w, b
            const((C, 3 * C)), const((1, 3 * C)),              # fused c_attn W, b
            const((C, C)), const((1, C)),                      # attn c_proj W, b
            const((1, C)), const((1, C)),                      # ln2 w, b
            const((C, 4 * C)), const((1, 4 * C)),              # c_fc W, b
            const((4 * C, C)), const((1, C)),                  # mlp c_proj W, b
        ],
        out_specs=pl.BlockSpec((None, T, C), lambda b: (b, 0, 0)),
        scratch_shapes=[pltpu.VMEM((T, C), jnp.float32)],      # per-head outs slab
        compiler_params=pltpu.CompilerParams(
            dimension_semantics=("parallel",),                 # shard B over TCs
            vmem_limit_bytes=32 * 1024 * 1024),
    )(x, ln1w, ln1b, wqkv, bqkv, wo, bo, ln2w, ln2b, wfc, bfc, wp, bp)

    return out


# ----------------------------------------------------------------------------
# Parameter init (deterministic): N(0, 0.02) linears, zero biases, LN ones/zeros
# ----------------------------------------------------------------------------
def init_block_params(key, n_embd):
    kq, ko, kf, kp = jax.random.split(key, 4)
    std = 0.02
    return (
        jnp.ones((1, n_embd), jnp.float32),                                  # ln1 w
        jnp.zeros((1, n_embd), jnp.float32),                                 # ln1 b
        std * jax.random.normal(kq, (n_embd, 3 * n_embd), jnp.float32),      # c_attn W
        jnp.zeros((1, 3 * n_embd), jnp.float32),                             # c_attn b
        std * jax.random.normal(ko, (n_embd, n_embd), jnp.float32),          # attn proj W
        jnp.zeros((1, n_embd), jnp.float32),                                 # attn proj b
        jnp.ones((1, n_embd), jnp.float32),                                  # ln2 w
        jnp.zeros((1, n_embd), jnp.float32),                                 # ln2 b
        std * jax.random.normal(kf, (n_embd, 4 * n_embd), jnp.float32),      # c_fc W
        jnp.zeros((1, 4 * n_embd), jnp.float32),                             # c_fc b
        std * jax.random.normal(kp, (4 * n_embd, n_embd), jnp.float32),      # mlp proj W
        jnp.zeros((1, n_embd), jnp.float32),                                 # mlp proj b
    )


# ----------------------------------------------------------------------------
# Pure-JAX reference (mirrors the PyTorch Block math exactly)
# ----------------------------------------------------------------------------
def block_ref(x, params, n_head):
    B, T, C = x.shape
    hd = C // n_head
    (l1w, l1b, wqkv, bqkv, wo, bo, l2w, l2b, wfc, bfc, wp, bpb) = params
    h = _layernorm(x, l1w[0], l1b[0])
    qkv = h @ wqkv + bqkv[0]
    q, k, v = jnp.split(qkv, 3, axis=-1)
    q = q.reshape(B, T, n_head, hd).transpose(0, 2, 1, 3)
    k = k.reshape(B, T, n_head, hd).transpose(0, 2, 1, 3)
    v = v.reshape(B, T, n_head, hd).transpose(0, 2, 1, 3)
    s = jnp.einsum('bhqd,bhkd->bhqk', q, k) / math.sqrt(hd)
    mask = jnp.tril(jnp.ones((T, T), bool))
    s = jnp.where(mask, s, -1e30)
    p = jax.nn.softmax(s, axis=-1)
    y = jnp.einsum('bhqk,bhkd->bhqd', p, v).transpose(0, 2, 1, 3).reshape(B, T, C)
    x = x + y @ wo + bo[0]
    h2 = _layernorm(x, l2w[0], l2b[0])
    u = _gelu_tanh(h2 @ wfc + bfc[0])
    x = x + u @ wp + bpb[0]
    return x


if __name__ == "__main__":
    B, T, C, N_HEAD = 2, 8, 32, 2
    key = jax.random.PRNGKey(0)
    k_param, k_x = jax.random.split(key)

    params = init_block_params(k_param, C)
    x = jax.random.normal(k_x, (B, T, C), jnp.float32)

    prepped = prepare_block_params(params, N_HEAD)   # one-time weight prep
    out = jax.block_until_ready(run_block(x, prepped, N_HEAD))

    ref = block_ref(x, params, N_HEAD)
    assert out.shape == (B, T, C)
    # Tolerance slightly looser than pure-f32 because the softmax denominator
    # uses the EUP approximate reciprocal (pl.reciprocal(approx=True)).
    assert jnp.allclose(out, ref, atol=2e-3, rtol=2e-3), "mismatch vs reference"

    # TODO(synk): bf16 MXU operands (v6e/v7x scaling lever) deliberately skipped
    # to keep near-f32 accuracy against the reference at this tiny model size.
    print("KERNEL_OK")
</pallas_src>

<mosaic_0001>
module attributes {stable_mosaic.version = 11 : i64} {
  func.func @block_kernel(%arg0: i32, %arg1: memref<1x8x32xf32, #tpu.memory_space<vmem>>, %arg2: memref<1x32xf32, #tpu.memory_space<vmem>>, %arg3: memref<1x32xf32, #tpu.memory_space<vmem>>, %arg4: memref<32x96xf32, #tpu.memory_space<vmem>>, %arg5: memref<1x96xf32, #tpu.memory_space<vmem>>, %arg6: memref<32x32xf32, #tpu.memory_space<vmem>>, %arg7: memref<1x32xf32, #tpu.memory_space<vmem>>, %arg8: memref<1x32xf32, #tpu.memory_space<vmem>>, %arg9: memref<1x32xf32, #tpu.memory_space<vmem>>, %arg10: memref<32x128xf32, #tpu.memory_space<vmem>>, %arg11: memref<1x128xf32, #tpu.memory_space<vmem>>, %arg12: memref<128x32xf32, #tpu.memory_space<vmem>>, %arg13: memref<1x32xf32, #tpu.memory_space<vmem>>, %arg14: memref<1x8x32xf32, #tpu.memory_space<vmem>>, %arg15: memref<8x32xf32, #tpu.memory_space<vmem>>) attributes {dimension_semantics = [#tpu.dimension_semantics<parallel>], iteration_bounds = array<i64: 2>, scalar_prefetch = 0 : i64, scratch_operands = 1 : i64, tpu.core_type = #tpu.core_type<tc>, window_params = [{transform_indices = @transform_0, window_bounds = array<i64: 1, 8, 32>}, {pipeline_mode = #tpu.pipeline_mode<synchronous>, transform_indices = @transform_1, window_bounds = array<i64: 1, 32>}, {pipeline_mode = #tpu.pipeline_mode<synchronous>, transform_indices = @transform_2, window_bounds = array<i64: 1, 32>}, {pipeline_mode = #tpu.pipeline_mode<synchronous>, transform_indices = @transform_3, window_bounds = array<i64: 32, 96>}, {pipeline_mode = #tpu.pipeline_mode<synchronous>, transform_indices = @transform_4, window_bounds = array<i64: 1, 96>}, {pipeline_mode = #tpu.pipeline_mode<synchronous>, transform_indices = @transform_5, window_bounds = array<i64: 32, 32>}, {pipeline_mode = #tpu.pipeline_mode<synchronous>, transform_indices = @transform_6, window_bounds = array<i64: 1, 32>}, {pipeline_mode = #tpu.pipeline_mode<synchronous>, transform_indices = @transform_7, window_bounds = array<i64: 1, 32>}, {pipeline_mode = #tpu.pipeline_mode<synchronous>, transform_indices = @transform_8, window_bounds = array<i64: 1, 32>}, {pipeline_mode = #tpu.pipeline_mode<synchronous>, transform_indices = @transform_9, window_bounds = array<i64: 32, 128>}, {pipeline_mode = #tpu.pipeline_mode<synchronous>, transform_indices = @transform_10, window_bounds = array<i64: 1, 128>}, {pipeline_mode = #tpu.pipeline_mode<synchronous>, transform_indices = @transform_11, window_bounds = array<i64: 128, 32>}, {pipeline_mode = #tpu.pipeline_mode<synchronous>, transform_indices = @transform_12, window_bounds = array<i64: 1, 32>}, {transform_indices = @transform_13, window_bounds = array<i64: 1, 8, 32>}]} {
    %c0 = arith.constant 0 : index
    %c0_0 = arith.constant 0 : index
    %c0_1 = arith.constant 0 : index
    %0 = vector.load %arg1[%c0, %c0_0, %c0_1] : memref<1x8x32xf32, #tpu.memory_space<vmem>>, vector<1x8x32xf32>
    %1 = vector.shape_cast %0 : vector<1x8x32xf32> to vector<8x32xf32>
    %c0_2 = arith.constant 0 : index
    %c0_3 = arith.constant 0 : index
    %2 = vector.load %arg2[%c0_2, %c0_3] : memref<1x32xf32, #tpu.memory_space<vmem>>, vector<1x32xf32>
    %3 = vector.shape_cast %2 : vector<1x32xf32> to vector<32xf32>
    %c0_4 = arith.constant 0 : index
    %c0_5 = arith.constant 0 : index
    %4 = vector.load %arg3[%c0_4, %c0_5] : memref<1x32xf32, #tpu.memory_space<vmem>>, vector<1x32xf32>
    %5 = vector.shape_cast %4 : vector<1x32xf32> to vector<32xf32>
    %cst = arith.constant dense<0.000000e+00> : vector<8xf32>
    %6 = vector.multi_reduction <add>, %1, %cst [1] : vector<8x32xf32> to vector<8xf32>
    %7 = vector.shape_cast %6 : vector<8xf32> to vector<8x1xf32>
    %cst_6 = arith.constant 3.200000e+01 : f32
    %8 = vector.broadcast %cst_6 : f32 to vector<8x1xf32>
    %9 = arith.divf %7, %8 : vector<8x1xf32>
    %10 = vector.broadcast %9 : vector<8x1xf32> to vector<8x32xf32>
    %11 = arith.subf %1, %10 : vector<8x32xf32>
    %12 = arith.mulf %11, %11 : vector<8x32xf32>
    %cst_7 = arith.constant dense<0.000000e+00> : vector<8xf32>
    %13 = vector.multi_reduction <add>, %12, %cst_7 [1] : vector<8x32xf32> to vector<8xf32>
    %14 = vector.shape_cast %13 : vector<8xf32> to vector<8x1xf32>
    %cst_8 = arith.constant 3.200000e+01 : f32
    %15 = vector.broadcast %cst_8 : f32 to vector<8x1xf32>
    %16 = arith.divf %14, %15 : vector<8x1xf32>
    %17 = vector.broadcast %9 : vector<8x1xf32> to vector<8x32xf32>
    %18 = arith.subf %1, %17 : vector<8x32xf32>
    %cst_9 = arith.constant 9.99999974E-6 : f32
    %19 = vector.broadcast %cst_9 : f32 to vector<8x1xf32>
    %20 = arith.addf %16, %19 : vector<8x1xf32>
    %21 = math.rsqrt %20 : vector<8x1xf32>
    %22 = vector.broadcast %21 : vector<8x1xf32> to vector<8x32xf32>
    %23 = arith.mulf %18, %22 : vector<8x32xf32>
    %24 = vector.shape_cast %3 : vector<32xf32> to vector<1x32xf32>
    %25 = vector.broadcast %24 : vector<1x32xf32> to vector<8x32xf32>
    %26 = arith.mulf %23, %25 : vector<8x32xf32>
    %27 = vector.shape_cast %5 : vector<32xf32> to vector<1x32xf32>
    %28 = vector.broadcast %27 : vector<1x32xf32> to vector<8x32xf32>
    %29 = arith.addf %26, %28 : vector<8x32xf32>
    %c0_10 = arith.constant 0 : index
    %c0_11 = arith.constant 0 : index
    %30 = vector.load %arg4[%c0_10, %c0_11] : memref<32x96xf32, #tpu.memory_space<vmem>>, vector<32x96xf32>
    %cst_12 = arith.constant dense<0.000000e+00> : vector<8x96xf32>
    %31 = tpu.matmul %29, %30, %cst_12 {dimension_numbers = #tpu.dot_dimension_numbers<[1], [0], [0], [1], [0, 0, 1, 1], [], []>} : vector<8x32xf32>, vector<32x96xf32>, vector<8x96xf32> -> vector<8x96xf32>
    %c0_13 = arith.constant 0 : index
    %c0_14 = arith.constant 0 : index
    %32 = vector.load %arg5[%c0_13, %c0_14] : memref<1x96xf32, #tpu.memory_space<vmem>>, vector<1x96xf32>
    %33 = vector.shape_cast %32 : vector<1x96xf32> to vector<96xf32>
    %34 = vector.shape_cast %33 : vector<96xf32> to vector<1x96xf32>
    %35 = vector.broadcast %34 : vector<1x96xf32> to vector<8x96xf32>
    %36 = arith.addf %31, %35 : vector<8x96xf32>
    %37 = tpu.iota {dimensions = array<i32: 0>} : vector<8x8xi32>
    %38 = tpu.iota {dimensions = array<i32: 1>} : vector<8x8xi32>
    %39 = arith.cmpi sle, %38, %37 : vector<8x8xi32>
    %40 = vector.extract_strided_slice %36 {offsets = [0, 0], sizes = [8, 16], strides = [1, 1]} : vector<8x96xf32> to vector<8x16xf32>
    %41 = vector.extract_strided_slice %36 {offsets = [0, 32], sizes = [8, 16], strides = [1, 1]} : vector<8x96xf32> to vector<8x16xf32>
    %42 = vector.extract_strided_slice %36 {offsets = [0, 64], sizes = [8, 16], strides = [1, 1]} : vector<8x96xf32> to vector<8x16xf32>
    %cst_15 = arith.constant dense<0.000000e+00> : vector<8x8xf32>
    %43 = tpu.matmul %40, %41, %cst_15 {dimension_numbers = #tpu.dot_dimension_numbers<[1], [1], [0], [0], [0, 0, 1, 0], [], []>} : vector<8x16xf32>, vector<8x16xf32>, vector<8x8xf32> -> vector<8x8xf32>
    %cst_16 = arith.constant -1.000000e+30 : f32
    %44 = vector.broadcast %cst_16 : f32 to vector<8x8xf32>
    %45 = arith.select %39, %43, %44 : vector<8x8xi1>, vector<8x8xf32>
    %cst_17 = arith.constant dense<0xFF800000> : vector<8xf32>
    %46 = vector.multi_reduction <maximumf>, %45, %cst_17 [1] : vector<8x8xf32> to vector<8xf32>
    %47 = vector.shape_cast %46 : vector<8xf32> to vector<8x1xf32>
    %48 = vector.broadcast %47 : vector<8x1xf32> to vector<8x8xf32>
    %49 = arith.subf %45, %48 : vector<8x8xf32>
    %50 = math.exp %49 : vector<8x8xf32>
    %cst_18 = arith.constant dense<0.000000e+00> : vector<8xf32>
    %51 = vector.multi_reduction <add>, %50, %cst_18 [1] : vector<8x8xf32> to vector<8xf32>
    %52 = vector.shape_cast %51 : vector<8xf32> to vector<8x1xf32>
    %cst_19 = arith.constant dense<0.000000e+00> : vector<8x16xf32>
    %53 = tpu.matmul %50, %42, %cst_19 {dimension_numbers = #tpu.dot_dimension_numbers<[1], [0], [0], [1], [0, 0, 1, 1], [], []>} : vector<8x8xf32>, vector<8x16xf32>, vector<8x16xf32> -> vector<8x16xf32>
    %54 = tpu.reciprocal %52 {approx = true} : vector<8x1xf32> -> vector<8x1xf32>
    %55 = vector.broadcast %54 : vector<8x1xf32> to vector<8x16xf32>
    %56 = arith.mulf %53, %55 : vector<8x16xf32>
    %c0_20 = arith.constant 0 : index
    %c0_21 = arith.constant 0 : index
    %57 = vector.load %arg15[%c0_20, %c0_21] : memref<8x32xf32, #tpu.memory_space<vmem>>, vector<8x16xf32>
    tpu.vector_store %arg15[%c0_20, %c0_21], %56 {strides = array<i32>} : memref<8x32xf32, #tpu.memory_space<vmem>>, vector<8x16xf32>,
    %58 = vector.extract_strided_slice %36 {offsets = [0, 16], sizes = [8, 16], strides = [1, 1]} : vector<8x96xf32> to vector<8x16xf32>
    %59 = vector.extract_strided_slice %36 {offsets = [0, 48], sizes = [8, 16], strides = [1, 1]} : vector<8x96xf32> to vector<8x16xf32>
    %60 = vector.extract_strided_slice %36 {offsets = [0, 80], sizes = [8, 16], strides = [1, 1]} : vector<8x96xf32> to vector<8x16xf32>
    %cst_22 = arith.constant dense<0.000000e+00> : vector<8x8xf32>
    %61 = tpu.matmul %58, %59, %cst_22 {dimension_numbers = #tpu.dot_dimension_numbers<[1], [1], [0], [0], [0, 0, 1, 0], [], []>} : vector<8x16xf32>, vector<8x16xf32>, vector<8x8xf32> -> vector<8x8xf32>
    %cst_23 = arith.constant -1.000000e+30 : f32
    %62 = vector.broadcast %cst_23 : f32 to vector<8x8xf32>
    %63 = arith.select %39, %61, %62 : vector<8x8xi1>, vector<8x8xf32>
    %cst_24 = arith.constant dense<0xFF800000> : vector<8xf32>
    %64 = vector.multi_reduction <maximumf>, %63, %cst_24 [1] : vector<8x8xf32> to vector<8xf32>
    %65 = vector.shape_cast %64 : vector<8xf32> to vector<8x1xf32>
    %66 = vector.broadcast %65 : vector<8x1xf32> to vector<8x8xf32>
    %67 = arith.subf %63, %66 : vector<8x8xf32>
    %68 = math.exp %67 : vector<8x8xf32>
    %cst_25 = arith.constant dense<0.000000e+00> : vector<8xf32>
    %69 = vector.multi_reduction <add>, %68, %cst_25 [1] : vector<8x8xf32> to vector<8xf32>
    %70 = vector.shape_cast %69 : vector<8xf32> to vector<8x1xf32>
    %cst_26 = arith.constant dense<0.000000e+00> : vector<8x16xf32>
    %71 = tpu.matmul %68, %60, %cst_26 {dimension_numbers = #tpu.dot_dimension_numbers<[1], [0], [0], [1], [0, 0, 1, 1], [], []>} : vector<8x8xf32>, vector<8x16xf32>, vector<8x16xf32> -> vector<8x16xf32>
    %72 = tpu.reciprocal %70 {approx = true} : vector<8x1xf32> -> vector<8x1xf32>
    %73 = vector.broadcast %72 : vector<8x1xf32> to vector<8x16xf32>
    %74 = arith.mulf %71, %73 : vector<8x16xf32>
    %c0_27 = arith.constant 0 : index
    %c16 = arith.constant 16 : index
    %75 = vector.load %arg15[%c0_27, %c16] : memref<8x32xf32, #tpu.memory_space<vmem>>, vector<8x16xf32>
    tpu.vector_store %arg15[%c0_27, %c16], %74 {strides = array<i32>} : memref<8x32xf32, #tpu.memory_space<vmem>>, vector<8x16xf32>,
    %c0_28 = arith.constant 0 : index
    %c0_29 = arith.constant 0 : index
    %76 = vector.load %arg15[%c0_28, %c0_29] : memref<8x32xf32, #tpu.memory_space<vmem>>, vector<8x32xf32>
    %c0_30 = arith.constant 0 : index
    %c0_31 = arith.constant 0 : index
    %77 = vector.load %arg6[%c0_30, %c0_31] : memref<32x32xf32, #tpu.memory_space<vmem>>, vector<32x32xf32>
    %cst_32 = arith.constant dense<0.000000e+00> : vector<8x32xf32>
    %78 = tpu.matmul %76, %77, %cst_32 {dimension_numbers = #tpu.dot_dimension_numbers<[1], [0], [0], [1], [0, 0, 1, 1], [], []>} : vector<8x32xf32>, vector<32x32xf32>, vector<8x32xf32> -> vector<8x32xf32>
    %79 = arith.addf %1, %78 : vector<8x32xf32>
    %c0_33 = arith.constant 0 : index
    %c0_34 = arith.constant 0 : index
    %80 = vector.load %arg7[%c0_33, %c0_34] : memref<1x32xf32, #tpu.memory_space<vmem>>, vector<1x32xf32>
    %81 = vector.shape_cast %80 : vector<1x32xf32> to vector<32xf32>
    %82 = vector.shape_cast %81 : vector<32xf32> to vector<1x32xf32>
    %83 = vector.broadcast %82 : vector<1x32xf32> to vector<8x32xf32>
    %84 = arith.addf %79, %83 : vector<8x32xf32>
    %c0_35 = arith.constant 0 : index
    %c0_36 = arith.constant 0 : index
    %85 = vector.load %arg8[%c0_35, %c0_36] : memref<1x32xf32, #tpu.memory_space<vmem>>, vector<1x32xf32>
    %86 = vector.shape_cast %85 : vector<1x32xf32> to vector<32xf32>
    %c0_37 = arith.constant 0 : index
    %c0_38 = arith.constant 0 : index
    %87 = vector.load %arg9[%c0_37, %c0_38] : memref<1x32xf32, #tpu.memory_space<vmem>>, vector<1x32xf32>
    %88 = vector.shape_cast %87 : vector<1x32xf32> to vector<32xf32>
    %cst_39 = arith.constant dense<0.000000e+00> : vector<8xf32>
    %89 = vector.multi_reduction <add>, %84, %cst_39 [1] : vector<8x32xf32> to vector<8xf32>
    %90 = vector.shape_cast %89 : vector<8xf32> to vector<8x1xf32>
    %cst_40 = arith.constant 3.200000e+01 : f32
    %91 = vector.broadcast %cst_40 : f32 to vector<8x1xf32>
    %92 = arith.divf %90, %91 : vector<8x1xf32>
    %93 = vector.broadcast %92 : vector<8x1xf32> to vector<8x32xf32>
    %94 = arith.subf %84, %93 : vector<8x32xf32>
    %95 = arith.mulf %94, %94 : vector<8x32xf32>
    %cst_41 = arith.constant dense<0.000000e+00> : vector<8xf32>
    %96 = vector.multi_reduction <add>, %95, %cst_41 [1] : vector<8x32xf32> to vector<8xf32>
    %97 = vector.shape_cast %96 : vector<8xf32> to vector<8x1xf32>
    %cst_42 = arith.constant 3.200000e+01 : f32
    %98 = vector.broadcast %cst_42 : f32 to vector<8x1xf32>
    %99 = arith.divf %97, %98 : vector<8x1xf32>
    %100 = vector.broadcast %92 : vector<8x1xf32> to vector<8x32xf32>
    %101 = arith.subf %84, %100 : vector<8x32xf32>
    %cst_43 = arith.constant 9.99999974E-6 : f32
    %102 = vector.broadcast %cst_43 : f32 to vector<8x1xf32>
    %103 = arith.addf %99, %102 : vector<8x1xf32>
    %104 = math.rsqrt %103 : vector<8x1xf32>
    %105 = vector.broadcast %104 : vector<8x1xf32> to vector<8x32xf32>
    %106 = arith.mulf %101, %105 : vector<8x32xf32>
    %107 = vector.shape_cast %86 : vector<32xf32> to vector<1x32xf32>
    %108 = vector.broadcast %107 : vector<1x32xf32> to vector<8x32xf32>
    %109 = arith.mulf %106, %108 : vector<8x32xf32>
    %110 = vector.shape_cast %88 : vector<32xf32> to vector<1x32xf32>
    %111 = vector.broadcast %110 : vector<1x32xf32> to vector<8x32xf32>
    %112 = arith.addf %109, %111 : vector<8x32xf32>
    %c0_44 = arith.constant 0 : index
    %c0_45 = arith.constant 0 : index
    %113 = vector.load %arg10[%c0_44, %c0_45] : memref<32x128xf32, #tpu.memory_space<vmem>>, vector<32x128xf32>
    %cst_46 = arith.constant dense<0.000000e+00> : vector<8x128xf32>
    %114 = tpu.matmul %112, %113, %cst_46 {dimension_numbers = #tpu.dot_dimension_numbers<[1], [0], [0], [1], [0, 0, 1, 1], [], []>} : vector<8x32xf32>, vector<32x128xf32>, vector<8x128xf32> -> vector<8x128xf32>
    %c0_47 = arith.constant 0 : index
    %c0_48 = arith.constant 0 : index
    %115 = vector.load %arg11[%c0_47, %c0_48] : memref<1x128xf32, #tpu.memory_space<vmem>>, vector<1x128xf32>
    %116 = vector.shape_cast %115 : vector<1x128xf32> to vector<128xf32>
    %117 = vector.shape_cast %116 : vector<128xf32> to vector<1x128xf32>
    %118 = vector.broadcast %117 : vector<1x128xf32> to vector<8x128xf32>
    %119 = arith.addf %114, %118 : vector<8x128xf32>
    %cst_49 = arith.constant 5.000000e-01 : f32
    %120 = vector.broadcast %cst_49 : f32 to vector<8x128xf32>
    %121 = arith.mulf %120, %119 : vector<8x128xf32>
    %cst_50 = arith.constant 4.471500e-02 : f32
    %122 = vector.broadcast %cst_50 : f32 to vector<8x128xf32>
    %123 = arith.mulf %122, %119 : vector<8x128xf32>
    %124 = arith.mulf %123, %119 : vector<8x128xf32>
    %125 = arith.mulf %124, %119 : vector<8x128xf32>
    %126 = arith.addf %119, %125 : vector<8x128xf32>
    %cst_51 = arith.constant 0.797884583 : f32
    %127 = vector.broadcast %cst_51 : f32 to vector<8x128xf32>
    %128 = arith.mulf %127, %126 : vector<8x128xf32>
    %129 = math.tanh %128 : vector<8x128xf32>
    %cst_52 = arith.constant 1.000000e+00 : f32
    %130 = vector.broadcast %cst_52 : f32 to vector<8x128xf32>
    %131 = arith.addf %130, %129 : vector<8x128xf32>
    %132 = arith.mulf %121, %131 : vector<8x128xf32>
    %c0_53 = arith.constant 0 : index
    %c0_54 = arith.constant 0 : index
    %133 = vector.load %arg12[%c0_53, %c0_54] : memref<128x32xf32, #tpu.memory_space<vmem>>, vector<128x32xf32>
    %cst_55 = arith.constant dense<0.000000e+00> : vector<8x32xf32>
    %134 = tpu.matmul %132, %133, %cst_55 {dimension_numbers = #tpu.dot_dimension_numbers<[1], [0], [0], [1], [0, 0, 1, 1], [], []>} : vector<8x128xf32>, vector<128x32xf32>, vector<8x32xf32> -> vector<8x32xf32>
    %c0_56 = arith.constant 0 : index
    %c0_57 = arith.constant 0 : index
    %135 = vector.load %arg13[%c0_56, %c0_57] : memref<1x32xf32, #tpu.memory_space<vmem>>, vector<1x32xf32>
    %136 = vector.shape_cast %135 : vector<1x32xf32> to vector<32xf32>
    %137 = vector.shape_cast %136 : vector<32xf32> to vector<1x32xf32>
    %138 = vector.broadcast %137 : vector<1x32xf32> to vector<8x32xf32>
    %139 = arith.addf %134, %138 : vector<8x32xf32>
    %140 = arith.addf %84, %139 : vector<8x32xf32>
    %c0_58 = arith.constant 0 : index
    %c0_59 = arith.constant 0 : index
    %c0_60 = arith.constant 0 : index
    %141 = vector.load %arg14[%c0_58, %c0_59, %c0_60] : memref<1x8x32xf32, #tpu.memory_space<vmem>>, vector<1x8x32xf32>
    %142 = vector.shape_cast %141 : vector<1x8x32xf32> to vector<8x32xf32>
    %143 = vector.shape_cast %140 : vector<8x32xf32> to vector<1x8x32xf32>
    tpu.vector_store %arg14[%c0_58, %c0_59, %c0_60], %143 {strides = array<i32>} : memref<1x8x32xf32, #tpu.memory_space<vmem>>, vector<1x8x32xf32>,
    return
  }
  func.func @transform_0(%arg0: i32) -> (i32, i32, i32) {
    %c0_i32 = arith.constant 0 : i32
    %c0_i32_0 = arith.constant 0 : i32
    %c0_i32_1 = arith.constant 0 : i32
    return %arg0, %c0_i32, %c0_i32_0 : i32, i32, i32
  }
  func.func @transform_1(%arg0: i32) -> (i32, i32) {
    %c0_i32 = arith.constant 0 : i32
    %c0_i32_0 = arith.constant 0 : i32
    %c0_i32_1 = arith.constant 0 : i32
    return %c0_i32, %c0_i32_0 : i32, i32
  }
  func.func @transform_2(%arg0: i32) -> (i32, i32) {
    %c0_i32 = arith.constant 0 : i32
    %c0_i32_0 = arith.constant 0 : i32
    %c0_i32_1 = arith.constant 0 : i32
    return %c0_i32, %c0_i32_0 : i32, i32
  }
  func.func @transform_3(%arg0: i32) -> (i32, i32) {
    %c0_i32 = arith.constant 0 : i32
    %c0_i32_0 = arith.constant 0 : i32
    %c0_i32_1 = arith.constant 0 : i32
    return %c0_i32, %c0_i32_0 : i32, i32
  }
  func.func @transform_4(%arg0: i32) -> (i32, i32) {
    %c0_i32 = arith.constant 0 : i32
    %c0_i32_0 = arith.constant 0 : i32
    %c0_i32_1 = arith.constant 0 : i32
    return %c0_i32, %c0_i32_0 : i32, i32
  }
  func.func @transform_5(%arg0: i32) -> (i32, i32) {
    %c0_i32 = arith.constant 0 : i32
    %c0_i32_0 = arith.constant 0 : i32
    %c0_i32_1 = arith.constant 0 : i32
    return %c0_i32, %c0_i32_0 : i32, i32
  }
  func.func @transform_6(%arg0: i32) -> (i32, i32) {
    %c0_i32 = arith.constant 0 : i32
    %c0_i32_0 = arith.constant 0 : i32
    %c0_i32_1 = arith.constant 0 : i32
    return %c0_i32, %c0_i32_0 : i32, i32
  }
  func.func @transform_7(%arg0: i32) -> (i32, i32) {
    %c0_i32 = arith.constant 0 : i32
    %c0_i32_0 = arith.constant 0 : i32
    %c0_i32_1 = arith.constant 0 : i32
    return %c0_i32, %c0_i32_0 : i32, i32
  }
  func.func @transform_8(%arg0: i32) -> (i32, i32) {
    %c0_i32 = arith.constant 0 : i32
    %c0_i32_0 = arith.constant 0 : i32
    %c0_i32_1 = arith.constant 0 : i32
    return %c0_i32, %c0_i32_0 : i32, i32
  }
  func.func @transform_9(%arg0: i32) -> (i32, i32) {
    %c0_i32 = arith.constant 0 : i32
    %c0_i32_0 = arith.constant 0 : i32
    %c0_i32_1 = arith.constant 0 : i32
    return %c0_i32, %c0_i32_0 : i32, i32
  }
  func.func @transform_10(%arg0: i32) -> (i32, i32) {
    %c0_i32 = arith.constant 0 : i32
    %c0_i32_0 = arith.constant 0 : i32
    %c0_i32_1 = arith.constant 0 : i32
    return %c0_i32, %c0_i32_0 : i32, i32
  }
  func.func @transform_11(%arg0: i32) -> (i32, i32) {
    %c0_i32 = arith.constant 0 : i32
    %c0_i32_0 = arith.constant 0 : i32
    %c0_i32_1 = arith.constant 0 : i32
    return %c0_i32, %c0_i32_0 : i32, i32
  }
  func.func @transform_12(%arg0: i32) -> (i32, i32) {
    %c0_i32 = arith.constant 0 : i32
    %c0_i32_0 = arith.constant 0 : i32
    %c0_i32_1 = arith.constant 0 : i32
    return %c0_i32, %c0_i32_0 : i32, i32
  }
  func.func @transform_13(%arg0: i32) -> (i32, i32, i32) {
    %c0_i32 = arith.constant 0 : i32
    %c0_i32_0 = arith.constant 0 : i32
    %c0_i32_1 = arith.constant 0 : i32
    return %arg0, %c0_i32, %c0_i32_0 : i32, i32, i32
  }
}

</mosaic_0001>

<bundles_post_ra>
// kernel: tpu_custom_call.1
= control target key start
LH: loop header
LB: loop body
LE: loop exit
PB: predicated region body
PF: predicated region fallthrough
CT: control target
= control target key end

     0   :  { %s1334_s0 = inlined_call_operand.vmem [shape: f32[2,8,32], index: 0, kind: input, shape index: {}]   ;;  %s1335_s1 = inlined_call_operand.vmem [shape: f32[1,32], index: 1, kind: input, shape index: {}]   ;;  %s1336_s2 = inlined_call_operand.vmem [shape: f32[1,32], index: 2, kind: input, shape index: {}]   ;;  %s1337_s3 = inlined_call_operand.vmem [shape: f32[32,96], index: 3, kind: input, shape index: {}]   ;;  %s1338_s4 = inlined_call_operand.vmem [shape: f32[1,96], index: 4, kind: input, shape index: {}]   ;;  %s1339_s5 = inlined_call_operand.vmem [shape: f32[32,32], index: 5, kind: input, shape index: {}]   ;;  %s1340_s6 = inlined_call_operand.vmem [shape: f32[1,32], index: 6, kind: input, shape index: {}]   ;;  %s1341_s7 = inlined_call_operand.vmem [shape: f32[1,32], index: 7, kind: input, shape index: {}]   ;;  %s1342_s8 = inlined_call_operand.vmem [shape: f32[1,32], index: 8, kind: input, shape index: {}]   ;;  %s1343_s9 = inlined_call_operand.vmem [shape: f32[32,128], index: 9, kind: input, shape index: {}]   ;;  %s1344_s10 = inlined_call_operand.vmem [shape: f32[1,128], index: 10, kind: input, shape index: {}]   ;;  %s1345_s11 = inlined_call_operand.vmem [shape: f32[128,32], index: 11, kind: input, shape index: {}]   ;;  %s1346_s12 = inlined_call_operand.vmem [shape: f32[1,32], index: 12, kind: input, shape index: {}]   ;;  %s1347_s13 = inlined_call_operand.hbm [shape: f32[2,8,32], index: 13, kind: output, shape index: {}]  }
   0x1   :  { %1348 = sst [smem:[#allocation6_spill]] %s1334_s0 }
   0x2   :  { %1349 = sst [smem:[#allocation7_spill]] %s1335_s1 }
   0x3   :  { %1350 = sst [smem:[#allocation8_spill]] %s1336_s2 }
   0x4   :  { %1351 = sst [smem:[#allocation9_spill]] %s1337_s3 }
   0x5   :  { %18 = vsyncpa [#allocation4], 0 }
   0x6   :  { %20 = vsyncpa [#allocation4 + $0x1], 0  ;;  %s1106_s25 = smov 0   ;;  %s1108_s26 = smov 0  }
   0x7   :  { %s1110_s27 = smov 0   ;;  %s1112_s28 = smov 0  }
   0x8 LB: > { %s1127_s29 = sadd.s32 4294967295, %s1027_s28   ;;  %s876_s30 = sadd.s32 4294967294, %s1027_s28   ;;  %s1027_s28 = sphi %s1112_s28, %s1361_s28   ;;  %s1023_s27 = sphi %s1110_s27, %s1360_s27   ;;  %s1019_s26 = sphi %s1108_s26, %s1359_s26   ;;  %s1015_s25 = sphi %s1106_s25, %s1358_s25  }
   0x9   : > { %s1131_s14 = sadd.s32 1, %s1027_s28   ;;  %s311_s15 = sadd.s32 1, %s1023_s27 }
   0xa   : > { %s308_s16 = ssub.s32 %s1027_s28, %s1131_s14  ;;  %p321_p0 = scmp.ne.s32.totalorder %s1023_s27, %s1019_s26 }
   0xb   : > { %p309_p1 = scmp.eq.s32.totalorder %s308_s16, 0  ;;  %p322_p2 = scmp.eq.s32.totalorder %s1127_s29, 1 }
   0xc   : > { %p327_p3 = scmp.ne.s32.totalorder %s1019_s26, %s1015_s25  ;;  %p328_p4 = scmp.eq.s32.totalorder %s876_s30, 1 }
   0xd   : > { %s1142_s17 = scalar_select %p309_p1, %s1023_s27, %s311_s15  }
   0xe   : > { %p1144_p5 = por %p322_p2, %p321_p0  ;;  %p1148_p6 = por %p328_p4, %p327_p3 }
   0xf   : > { %p879_p7 = scmp.ge.s32.totalorder %s1027_s28, 1  ;;  %p389_p8 = scmp.lt.s32.totalorder %s1027_s28, 3 }
  0x11   : > { %p390_p9 = pnand %p879_p7, %p389_p8 }
  0x12   : > { %p432_p10 = scmp.lt.s32.totalorder (!%p390_p9), %s1127_s29, 1  ;;  %s1354_s0 = sld [smem:[#allocation6_spill]] (!%p390_p9) }
  0x13   : > { %393 = sbr.rel (%p390_p9) target bundleno = 1746 (0x6d2), region = 72  ;;  %s1355_s3 = sld [smem:[#allocation9_spill]] (!%p390_p9) }
  0x14   : > { %s1356_s1 = sld [smem:[#allocation7_spill]] (!%p390_p9)  ;;  %s1030_s23 = smov (!%p390_p9), 112  }
  0x15   : > { %s1357_s2 = sld [smem:[#allocation8_spill]] (!%p390_p9)  ;;  %s1032_s30 = smov (!%p390_p9), 80  }
  0x16   : > { %s1033_s15 = smov (!%p390_p9), 64   ;;  %s1034_s16 = smov (!%p390_p9), 48  }
  0x18   : > { %s433_s20 = scalar_select %p432_p10, %s1127_s29, 1  ;;  %vm439_vm0 = vcmask 261120   ;;  %v1029_v2 = vmov 32.0   ;;  %v943_v33 = vld [vmem:[%s1338_s4] ss:$0 sm:$0xff]  ;;  %vm516_vm5 = vcmask 130048   ;;  %v508_v40 = vlaneseq }
  0x19   : > { %949 = vrcp.f32 %v1029_v2  ;;  %v480_v14 = vld [vmem:[%s1355_s3 + $0x18] sm:$0xff]  ;;  %v479_v15 = vld [vmem:[%s1355_s3 + $0x10] sm:$0xff]  ;;  %v478_v16 = vld [vmem:[%s1355_s3 + $0x8] sm:$0xff]  ;;  %vm542_vm7 = vcmask 64512   ;;  %vm651_vm8 = vcmask 261248  }
  0x1a   : > { %s881_s21 = sshll.u32 %s433_s20, 3  ;;  %500 = vmatpush.msra.mxu2 %v480_v14  ;;  %v477_v17 = vld [vmem:[%s1355_s3] sm:$0xff]  ;;  %v509_v41 = vshrl.u32 %v508_v40, 7  ;;  %v511_v42 = vand.u32 127, %v508_v40  ;;  %s1035_s20 = smov 16  }
  0x1b   : > { %s435_s24 = scalar_lea.vmem %s1354_s0, %s881_s21  ;;  %v941_v27 = vld [vmem:[%s1356_s1] ss:$0 sm:$0xff]  ;;  %s429_s1 = sand.u32 1, %s1019_s26  }
  0x1c   : > { %v1159_v0 = vld [vmem:[%s435_s24] sm:$0xff]  ;;  %501 = vmatpush.msra.mxu2 %v479_v15  ;;  %s1031_s24 = smov 96   ;;  %vm512_vm6 = vcmp.le.s32.totalorder %v511_v42, %v509_v41 }
  0x1d   : > { %v440_v1 = vsel %vm439_vm0, %v1159_v0, 0.0  ;;  %v942_v30 = vld [vmem:[%s1357_s2] ss:$0 sm:$0xff] }
  0x1e   : > { %441 = vadd.xlane.f32.xlu0 %v440_v1  ;;  %502 = vmatpush.msra.mxu2 %v478_v16  ;;  %v946_v40 = vld [vmem:[%s1342_s8] ss:$0 sm:$0xff] }
  0x1f   : > { %v950_v3 = vpop.eup %949 }
  0x20   : > { %v444_v4 = vmul.f32 32.0, %v950_v3  ;;  %vm448_vm1 = vweird.f32 %v950_v3  ;;  %503 = vmatpush.msra.mxu2 %v477_v17 }
  0x22   : > { %v445_v5 = vsub.f32 1.0, %v444_v4 }
  0x24   : > { %v446_v6 = vmul.f32 %v950_v3, %v445_v5  ;;  %v657_v5 = vld [vmem:[%s1339_s5 + $0x18] sm:$0xff] }
  0x26   : > { %v447_v7 = vadd.f32 %v950_v3, %v446_v6  ;;  %v656_v6 = vld [vmem:[%s1339_s5 + $0x10] sm:$0xff] }
  0x28   : > { %v1163_v8 = vsel %vm448_vm1, %v950_v3, %v447_v7  ;;  %v655_v7 = vld [vmem:[%s1339_s5 + $0x8] sm:$0xff] }
  0x91   : > { %v442_v9 = vpop.xlane.xlu0 %441 }
  0x92   : > { %v450_v10 = vmul.f32 %v1163_v8, %v442_v9  ;;  %v654_v9 = vld [vmem:[%s1339_s5] sm:$0xff] }
  0x94   : > { %v451_v11 = vsub.f32 %v1159_v0, %v450_v10 }
  0x96   : > { %v452_v12 = vmul.f32 %v451_v11, %v451_v11 }
  0x98   : > { %v453_v13 = vsel %vm439_vm0, %v452_v12, 0.0  ;;  %v944_v12 = vld [vmem:[%s1340_s6] ss:$0 sm:$0xff] }
  0x99   : > { %454 = vadd.xlane.f32.xlu0 %v453_v13 }
 0x10c   : > { %v455_v18 = vpop.xlane.xlu0 %454 }
 0x10d   : > { %v456_v19 = vmul.f32 %v455_v18, %v1163_v8 }
 0x10f   : > { %v457_v20 = vadd.f32 1e-05, %v456_v19 }
 0x111   : > { %951 = vrsqrt.f32 %v457_v20  ;;  %vm464_vm3 = vweird.f32 %v457_v20 }
 0x117   : > { %v952_v21 = vpop.eup %951 }
 0x118   : > { %v459_v22 = vmul.f32 %v952_v21, %v457_v20  ;;  %vm465_vm2 = vweird.f32 %v952_v21 }
 0x119   : > { %vm466_vm4 = vmor %vm464_vm3, %vm465_vm2 }
 0x11a   : > { %v460_v23 = vmul.f32 %v952_v21, %v459_v22  ;;  %v722_v22 = vld [vmem:[%s1343_s9 + $0x18] sm:$0xff] }
 0x11c   : > { %v461_v24 = vmul.f32 0.5, %v460_v23  ;;  %v720_v23 = vld [vmem:[%s1343_s9 + $0x8] sm:$0xff] }
 0x11e   : > { %v462_v25 = vsub.f32 1.5, %v461_v24  ;;  %v719_v24 = vld [vmem:[%s1343_s9] sm:$0xff] }
 0x120   : > { %v463_v26 = vmul.f32 %v952_v21, %v462_v25  ;;  %v774_v25 = vld [vmem:[%s1345_s11 + $0x78] sm:$0xff] }
 0x121   : > { %779 = vmatpush.msra.mxu0 %v774_v25 }
 0x122   : > { %v467_v28 = vsel %vm466_vm4, %v952_v21, %v463_v26  ;;  %v773_v26 = vld [vmem:[%s1345_s11 + $0x70] sm:$0xff] }
 0x123   : > { %v468_v29 = vmul.f32 %v467_v28, %v451_v11  ;;  %780 = vmatpush.msra.mxu0 %v773_v26 }
 0x125   : > { %v472_v31 = vmul.f32 %v941_v27, %v468_v29  ;;  %v772_v27 = vld [vmem:[%s1345_s11 + $0x68] sm:$0xff] }
 0x126   : > { %781 = vmatpush.msra.mxu0 %v772_v27 }
 0x127   : > { %v476_v32 = vadd.f32 %v942_v30, %v472_v31  ;;  %v771_v30 = vld [vmem:[%s1345_s11 + $0x60] sm:$0xff] }
 0x128   : > { %782 = vmatpush.msra.mxu0 %v771_v30 }
 0x129   : > { %882 = vmatmul.msk.f32.vlgmr.msra.gmra.mxu2 %vm439_vm0, %v476_v32 }
 0x1ac   : > { %v505_v34 = vpop.f32.mrf.mxu2 }
 0x1ad   : > { %v506_v35 = vadd.f32 %v943_v33, %v505_v34 }
 0x1af   : > { %581 = vrot.lane.b32.xlu2 %v506_v35, %s1030_s23  ;;  %514 = vrot.lane.b32.xlu1 %v506_v35, %s1031_s24 }
 0x1b7   : > { %583 = vrot.lane.b32.xlu1 %v506_v35, %s1032_s30 }
 0x1bf   : > { %552 = vrot.lane.b32.xlu1 %v506_v35, %s1033_s15 }
 0x209   : > { %v582_v38 = vpop.permute.xlu2 %581 }
 0x221   : > { %v515_v36 = vpop.permute.xlu1 %514 }
 0x222   : > { %883 = vmatpush.xpose.msk.msra.mxu1 %vm516_vm5, %v515_v36 }
 0x225   : > { %884 = vmatmul.msk.f32.vlgmr.msra.gmra.mxu1 %vm516_vm5, %v506_v35 }
 0x226   : > { %673 = vmatpush.msrb.mxu1 %v657_v5 }
 0x228   : > { %674 = vmatpush.msrb.mxu1 %v656_v6 }
 0x229   : > { %v584_v37 = vpop.permute.xlu1 %583 }
 0x22a   : > { %886 = vmatpush.xpose.msk.msra.mxu3 %vm516_vm5, %v584_v37  ;;  %675 = vmatpush.msrb.mxu1 %v655_v7 }
 0x22c   : > { %676 = vmatpush.msrb.mxu1 %v654_v9 }
 0x22d   : > { %887 = vmatmul.msk.f32.vlgmr.msra.gmra.mxu3 %vm516_vm5, %v582_v38 }
 0x22e   : > { %742 = vmatpush.msrb.mxu3 %v722_v22 }
 0x231   : > { %v553_v39 = vpop.permute.xlu1 %552 }
 0x232   : > { %573 = vmatpush.msrb.mxu2 %v553_v39 }
 0x2a2   : > { %v538_v43 = vpop.f32.mrf.mxu1 }
 0x2a3   : > { %v541_v44 = vsel %vm512_vm6, %v538_v43, -1e+30  ;;  %v770_v43 = vld [vmem:[%s1345_s11 + $0x58] sm:$0xff] }
 0x2a4   : > { %v543_v45 = vsel %vm542_vm7, %v541_v44, -inf  ;;  %783 = vmatpush.msra.mxu0 %v770_v43 }
 0x2a5   : > { %544 = vmax.xlane.f32.xlu2 %v543_v45  ;;  %v768_v45 = vld [vmem:[%s1345_s11 + $0x48] sm:$0xff] }
 0x2b0   : > { %v606_v46 = vpop.f32.mrf.mxu3 }
 0x2b1   : > { %v609_v47 = vsel %vm512_vm6, %v606_v46, -1e+30  ;;  %v767_v46 = vld [vmem:[%s1345_s11 + $0x40] sm:$0xff] }
 0x2b2   : > { %v610_v48 = vsel %vm542_vm7, %v609_v47, -inf }
 0x2b3   : > { %611 = vmax.xlane.f32.xlu0 %v610_v48  ;;  %v765_v48 = vld [vmem:[%s1345_s11 + $0x30] sm:$0xff] }
 0x2c7   : > { %619 = vrot.lane.b32.xlu0 %v506_v35, %s1034_s16  ;;  %s880_s16 = sshll.u32 %s429_s1, 3 }
 0x2c8   : > { %s431_s30 = scalar_lea.vmem [#allocation3], %s880_s16  ;;  %s985_s16 = scalar_lea.hbm %s1347_s13, 16 }
 0x2c9   : > { %s814_s15 = sshll.u32 %s431_s30, 4  ;;  %s815_s15 = int_to_ptr.vmem [resolvable:$true] %s814_s15 }
 0x318   : > { %v545_v49 = vpop.xlane.xlu2 %544 }
 0x319   : > { %v546_v50 = vsub.f32 %v541_v44, %v545_v49  ;;  %v769_v44 = vld [vmem:[%s1345_s11 + $0x50] sm:$0xff]  ;;  %v764_v49 = vld [vmem:[%s1345_s11 + $0x28] sm:$0xff] }
 0x31a   : > { %784 = vmatpush.msra.mxu0 %v769_v44 }
 0x31b   : > { %v547_v51 = vmul.f32 1.442695, %v546_v50  ;;  %v763_v50 = vld [vmem:[%s1345_s11 + $0x20] sm:$0xff] }
 0x31c   : > { %785 = vmatpush.msra.mxu0 %v768_v45 }
 0x31d   : > { %953 = vpow2.f32 %v547_v51  ;;  %v762_v51 = vld [vmem:[%s1345_s11 + $0x18] sm:$0xff] }
 0x31e   : > { %786 = vmatpush.msra.mxu0 %v767_v46 }
 0x323   : > { %v954_v52 = vpop.eup %953 }
 0x324   : > { %885 = vmatmul.msk.f32.vlgmr.msrb.gmra.mxu2 %vm542_vm7, %v954_v52  ;;  %v549_v53 = vsel %vm542_vm7, %v954_v52, 0.0  ;;  %v761_v52 = vld [vmem:[%s1345_s11 + $0x10] sm:$0xff] }
 0x325   : > { %550 = vadd.xlane.f32.xlu0 %v549_v53  ;;  %v760_v53 = vld [vmem:[%s1345_s11 + $0x8] sm:$0xff] }
 0x326   : > { %v612_v54 = vpop.xlane.xlu0 %611 }
 0x327   : > { %v613_v55 = vsub.f32 %v609_v47, %v612_v54  ;;  %v766_v47 = vld [vmem:[%s1345_s11 + $0x38] sm:$0xff]  ;;  %v759_v54 = vld [vmem:[%s1345_s11] sm:$0xff] }
 0x328   : > { %787 = vmatpush.msra.mxu0 %v766_v47 }
 0x329   : > { %v614_v56 = vmul.f32 1.442695, %v613_v55  ;;  %v947_v55 = vld [vmem:[%s1344_s10] ss:$0 sm:$0xff] }
 0x32a   : > { %788 = vmatpush.msra.mxu0 %v765_v48 }
 0x32b   : > { %955 = vpow2.f32 %v614_v56 }
 0x32c   : > { %789 = vmatpush.msra.mxu0 %v764_v49 }
 0x32e   : > { %790 = vmatpush.msra.mxu0 %v763_v50 }
 0x330   : > { %791 = vmatpush.msra.mxu0 %v762_v51 }
 0x331   : > { %v956_v57 = vpop.eup %955 }
 0x332   : > { %v616_v58 = vsel %vm542_vm7, %v956_v57, 0.0  ;;  %792 = vmatpush.msra.mxu0 %v761_v52 }
 0x333   : > { %617 = vadd.xlane.f32.xlu1 %v616_v58 }
 0x334   : > { %793 = vmatpush.msra.mxu0 %v760_v53 }
 0x336   : > { %794 = vmatpush.msra.mxu0 %v759_v54 }
 0x339   : > { %v620_v59 = vpop.permute.xlu0 %619 }
 0x33a   : > { %640 = vmatpush.msra.mxu2 %v620_v59 }
 0x33b   : > { %888 = vmatmul.msk.f32.vlgmr.msra.gmra.mxu2 %vm542_vm7, %v956_v57 }
 0x398   : > { %v551_v60 = vpop.xlane.xlu0 %550 }
 0x399   : > { %957 = vrcp.f32 %v551_v60 }
 0x39f   : > { %v958_v61 = vpop.eup %957 }
 0x3a6   : > { %v618_v1 = vpop.xlane.xlu1 %617 }
 0x3a7   : > { %v575_v62 = vpop.f32.mrf.mxu2  ;;  %959 = vrcp.f32 %v618_v1 }
 0x3a8   : > { %v579_v63 = vmul.f32 %v958_v61, %v575_v62 }
 0x3aa   : > { %580 = vst.msk [vmem:[#allocation2] sm:$0xff] %vm516_vm5, %v579_v63 }
 0x3ad   : > { %v960_v2 = vpop.eup %959 }
 0x3be   : > { %v642_v3 = vpop.f32.mrf.mxu2 }
 0x3bf   : > { %v646_v4 = vmul.f32 %v960_v2, %v642_v3 }
 0x3c1   : > { %648 = vrot.lane.b32.xlu2 %v646_v4, %s1035_s20  ;;  %s892_s20 = sshll.u32 %s1127_s29, 3  ;;  %v948_v4 = vld [vmem:[%s1346_s12] ss:$0 sm:$0xff]  ;;  %s802_s29 = scalar_lea.sflag [#allocation4], %s429_s1 }
 0x3c2   : > { %s812_s24 = scalar_lea.hbm %s1347_s13, %s892_s20 }
 0x3c3   : > { %s816_s2 = sshll.u32 %s812_s24, 4  ;;  %s817_s2 = int_to_ptr.hbm [resolvable:$true] %s816_s2 }
 0x3c4   : > { %s979_s3 = sshra.s32 %s817_s2, 4  ;;  %s980_s3 = int_to_ptr.hbm [resolvable:$true] %s979_s3 }
 0x3c5   : > { %s981_s21 = scalar_lea.hbm %s980_s3, 8  ;;  %p986_p0 = scmp.lt.s32.totalorder %s980_s3, %s1347_s13 }
 0x3c6   : > { %p982_p11 = scmp.ne.s32.totalorder %s980_s3, %s981_s21  ;;  %p987_p1 = scmp.lt.s32.totalorder %s985_s16, %s981_s21 }
 0x3c8   : > { %p983_p12 = pnand %p982_p11, %p1144_p5  ;;  %p988_p2 = por %p987_p1, %p986_p0 }
 0x3ca   : > { %p984_p13 = pneg %p983_p12 }
 0x3cc   : > { %p989_p3 = pnand %p988_p2, %p984_p13 }
 0x41b   : > { %v649_v10 = vpop.permute.xlu2 %648 }
 0x41c   : > { %652 = vst.msk [vmem:[#allocation2] sm:$0xff] %vm651_vm8, %v649_v10 }
 0x423   : > { %v653_v11 = vld [vmem:[#allocation2] sm:$0xff] }
 0x424   : > { %889 = vmatmul.msk.f32.vlgmr.msrb.gmra.mxu1 %vm439_vm0, %v653_v11 }
 0x4a1   : > { %v678_v13 = vpop.f32.mrf.mxu1 }
 0x4a2   : > { %v681_v14 = vadd.f32 %v678_v13, %v1159_v0  ;;  %v721_v0 = vld [vmem:[%s1343_s9 + $0x10] sm:$0xff] }
 0x4a3   : > { %743 = vmatpush.msrb.mxu3 %v721_v0 }
 0x4a4   : > { %v1219_v15 = vadd.f32 %v944_v12, %v681_v14 }
 0x4a5   : > { %744 = vmatpush.msrb.mxu3 %v720_v23 }
 0x4a6   : > { %v689_v16 = vsel %vm439_vm0, %v1219_v15, 0.0 }
 0x4a7   : > { %690 = vadd.xlane.f32.xlu1 %v689_v16  ;;  %745 = vmatpush.msrb.mxu3 %v719_v24 }
 0x51a   : > { %v691_v17 = vpop.xlane.xlu1 %690 }
 0x51b   : > { %v692_v18 = vmul.f32 %v691_v17, %v1163_v8 }
 0x51d   : > { %v693_v19 = vsub.f32 %v1219_v15, %v692_v18 }
 0x51f   : > { %v694_v20 = vmul.f32 %v693_v19, %v693_v19 }
 0x521   : > { %v695_v21 = vsel %vm439_vm0, %v694_v20, 0.0 }
 0x522   : > { %696 = vadd.xlane.f32.xlu2 %v695_v21 }
 0x595   : > { %v697_v28 = vpop.xlane.xlu2 %696 }
 0x596   : > { %v698_v29 = vmul.f32 %v697_v28, %v1163_v8  ;;  %v945_v8 = vld [vmem:[%s1341_s7] ss:$0 sm:$0xff] }
 0x598   : > { %v699_v31 = vadd.f32 1e-05, %v698_v29 }
 0x59a   : > { %961 = vrsqrt.f32 %v699_v31  ;;  %vm706_vm10 = vweird.f32 %v699_v31 }
 0x5a0   : > { %v962_v32 = vpop.eup %961 }
 0x5a1   : > { %v701_v33 = vmul.f32 %v962_v32, %v699_v31  ;;  %vm707_vm9 = vweird.f32 %v962_v32 }
 0x5a2   : > { %vm708_vm11 = vmor %vm706_vm10, %vm707_vm9 }
 0x5a3   : > { %v702_v34 = vmul.f32 %v962_v32, %v701_v33 }
 0x5a5   : > { %v703_v35 = vmul.f32 0.5, %v702_v34 }
 0x5a7   : > { %v704_v36 = vsub.f32 1.5, %v703_v35 }
 0x5a9   : > { %v705_v37 = vmul.f32 %v962_v32, %v704_v36 }
 0x5ab   : > { %v709_v38 = vsel %vm708_vm11, %v962_v32, %v705_v37 }
 0x5ac   : > { %v710_v39 = vmul.f32 %v709_v38, %v693_v19 }
 0x5ae   : > { %v714_v41 = vmul.f32 %v945_v8, %v710_v39 }
 0x5b0   : > { %v718_v42 = vadd.f32 %v946_v40, %v714_v41 }
 0x5b2   : > { %890 = vmatmul.msk.f32.vlgmr.msrb.gmra.mxu3 %vm439_vm0, %v718_v42 }
 0x635   : > { %v747_v56 = vpop.f32.mrf.mxu3 }
 0x636   : > { %v748_v57 = vadd.f32 %v947_v55, %v747_v56 }
 0x638   : > { %v751_v58 = vmul.f32 0.044715, %v748_v57  ;;  %v750_v1 = vmul.f32 0.5, %v748_v57 }
 0x63a   : > { %v752_v59 = vmul.f32 %v751_v58, %v748_v57 }
 0x63c   : > { %v753_v60 = vmul.f32 %v752_v59, %v748_v57 }
 0x63e   : > { %v754_v61 = vadd.f32 %v753_v60, %v748_v57 }
 0x640   : > { %v755_v62 = vmul.f32 0.7978846, %v754_v61 }
 0x642   : > { %963 = vtanh.f32 %v755_v62 }
 0x648   : > { %v964_v63 = vpop.eup %963 }
 0x649   : > { %v757_v2 = vadd.f32 1.0, %v964_v63 }
 0x64b   : > { %v758_v3 = vmul.f32 %v757_v2, %v750_v1 }
 0x64d   : > { %795 = vmatmul.f32.vlgmr.msra.gmra.mxu0 %v758_v3 }
 0x6ca   : > { %v796_v5 = vpop.f32.mrf.mxu0 }
 0x6cb   : > { %v797_v6 = vadd.f32 %v948_v4, %v796_v5 }
 0x6cd   : > { %v799_v7 = vadd.f32 %v797_v6, %v1219_v15 }
 0x6cf   : > { %800 = vst.msk [vmem:[%s431_s30] sm:$0xff] %vm439_vm0, %v799_v7 }
 0x6d0   : > { %992 = shalt.err (!%p989_p3)
}
 0x6d1   : > { %895 = dma.vmem_to_hbm [thread:$0]  (%p1144_p5), %s815_s15, 128, %s817_s2, %s802_s29  }
 0x6d2 PF: > { %p901_p4 = scmp.ge.s32.totalorder %s1027_s28, 2  ;;  %s828_s1 = sand.u32 1, %s1015_s25  }
 0x6d3   : > { %s829_s24 = scalar_lea.sflag [#allocation4], %s828_s1 }
 0x6d4   : > { %p898_p7 = pnand %p901_p4, %p1148_p6 }
 0x6d6   : > { %p899_p8 = pneg %p898_p7 }
 0x6d8   : > { %1010 = dma.done.wait (%p899_p8), %s829_s24, 128  }
 0x6d9   : > { %1012 = vsyncadd (%p899_p8), %s829_s24, 4294967168  ;;  %p23_p9 = scmp.ge.s32.totalorder %s1131_s14, 4   ;;  %s1358_s25 = smov %s1019_s26 }
 0x6da   : > { %s1359_s26 = smov %s1023_s27  ;;  %s1360_s27 = smov %s1142_s17 }
 0x6db   : > { %s1361_s28 = smov %s1131_s14  ;;  %25 = sbr.rel (!%p23_p9) target bundleno = 8 (0x8), region = 107 }
 0x6e0   :  { %835 = vsyncpa [#allocation4], 1 }
 0x6e1   :  { %837 = vsyncpa [#allocation4 + $0x1], 1 }

</bundles_post_ra>
